<compile_context>
chip_gen: v5e
topology: v5e:2x2
jax: 0.10.0
libtpu: 0.0.40
codegen_flags: <defaults>
</compile_context>

<pallas_src>
import functools

import jax
import jax.numpy as jnp
from jax.experimental import pallas as pl
from jax.experimental.pallas import tpu as pltpu


_LANE = 128      # vreg lane width
_SUBLANE = 8     # f32 sublane packing


def _round_up(x, m):
    return (x + m - 1) // m * m


# ---------------------------------------------------------------------------
# Kernel: fused encoder + decoder for one batch tile.  All four matmuls run on
# the MXU with bf16 operands and f32 accumulation; bias add / ReLU stay on the
# VPU and sigmoid on the EUP, all in f32.
# ---------------------------------------------------------------------------
def _ae_kernel(x_ref,
               w1_ref, b1_ref, w2_ref, b2_ref,   # encoder (weights bf16, biases f32)
               w3_ref, b3_ref, w4_ref, b4_ref,   # decoder (weights bf16, biases f32)
               latent_ref, recon_ref):
    x = x_ref[...].astype(jnp.bfloat16)

    # ---- Encoder: Linear -> ReLU -> Linear ----
    h1 = jnp.dot(x, w1_ref[...].astype(jnp.bfloat16),
                 preferred_element_type=jnp.float32) + b1_ref[...]
    h1 = jnp.maximum(h1, 0.0)                                        # ReLU (VPU)
    z = jnp.dot(h1.astype(jnp.bfloat16), w2_ref[...].astype(jnp.bfloat16),
                preferred_element_type=jnp.float32) + b2_ref[...]
    latent_ref[...] = z.astype(latent_ref.dtype)                     # true-width latent store

    # ---- Decoder: Linear -> ReLU -> Linear -> Sigmoid ----
    h2 = jnp.dot(z.astype(jnp.bfloat16), w3_ref[...].astype(jnp.bfloat16),
                 preferred_element_type=jnp.float32) + b3_ref[...]
    h2 = jnp.maximum(h2, 0.0)                                        # ReLU (VPU)
    y = jnp.dot(h2.astype(jnp.bfloat16), w4_ref[...].astype(jnp.bfloat16),
                preferred_element_type=jnp.float32) + b4_ref[...]
    recon_ref[...] = jax.nn.sigmoid(y).astype(recon_ref.dtype)       # Sigmoid (EUP)


# ---------------------------------------------------------------------------
# Generation-aware VMEM budget and tile selection.
# ---------------------------------------------------------------------------
@functools.lru_cache(maxsize=None)
def _vmem_budget_bytes():
    """Physical VMEM per TensorCore minus headroom for Mosaic internal scratch."""
    try:
        info = pltpu.get_tpu_info()
        capacity = int(getattr(info, "vmem_capacity_bytes", 128 << 20))
    except Exception:  # conservative fallback (v7x-sized): 64 MiB per TC
        capacity = 64 << 20
    return max(capacity - (16 << 20), 16 << 20)


def _per_row_vmem_bytes(D, H, L):
    """Approximate VMEM bytes per batch row of the fused chain."""
    io = 2 * 4 * (2 * D + L)            # double-buffered f32 x / recon / latent tiles
    interm = 6 * (D + 2 * H + L)        # bf16+f32 intermediates (x, h1, z, h2, y)
    return io + interm


def _resident_weight_bytes(D, H, L):
    """bf16 weights + f32 biases, charged 2x for the default double-buffering."""
    w = 2 * (D * H + H * L + L * H + H * D)   # bf16
    b = 4 * (2 * H + L + D)                   # f32
    return 2 * (w + b)


def _pick_batch_tile(B, D, H, L, vmem_budget):
    """Largest batch tile that fits the VMEM budget.  Single maximal tile when
    the whole batch fits (best on single-TC v5e/v6e); otherwise an even number
    of grid steps so the 'parallel' axis splits evenly over v7x's 2 TCs."""
    per_row = _per_row_vmem_bytes(D, H, L)
    avail = max(vmem_budget - _resident_weight_bytes(D, H, L) - (2 << 20), 1 << 20)
    tb_cap = (avail // per_row) // _SUBLANE * _SUBLANE
    tb_cap = max(_SUBLANE, min(1024, tb_cap))

    if B <= tb_cap:
        return max(_SUBLANE, _round_up(B, _SUBLANE))   # one tile covers the batch

    steps = pl.cdiv(B, tb_cap)
    if steps > 1 and steps % 2 == 1:                   # keep step count even (v7x: 2 TCs)
        steps += 1
    tb = max(_SUBLANE, _round_up(pl.cdiv(B, steps), _SUBLANE))
    return min(tb, tb_cap)


# ---------------------------------------------------------------------------
# Forward pass.
# ---------------------------------------------------------------------------
def prepare_params(params):
    """One-time preprocessing: cast weights to bf16 (halves their HBM traffic);
    biases stay f32.  Call once and reuse -- NOT per forward call."""
    w1, b1, w2, b2, w3, b3, w4, b4 = params
    cast = lambda w: w.astype(jnp.bfloat16)
    return (cast(w1), b1, cast(w2), b2, cast(w3), b3, cast(w4), b4)


@functools.partial(jax.jit, static_argnames=("tb",))
def _forward_impl(x, params, *, tb):
    w1, b1, w2, b2, w3, b3, w4, b4 = params
    B, D = x.shape
    H = w1.shape[1]
    L = w2.shape[1]

    grid = (pl.cdiv(B, tb),)   # ragged last tile: partial reads, OOB writes dropped

    def rep(shape):            # constant weight/bias block: same block every step
        return pl.BlockSpec(shape, lambda i: (0, 0))

    # VMEM limit: never request the full physical VMEM; size from the estimate.
    budget = _vmem_budget_bytes()
    est = _resident_weight_bytes(D, H, L) + tb * _per_row_vmem_bytes(D, H, L)
    vmem_limit = int(min(budget, max(32 << 20, 2 * est + (4 << 20))))

    w_bytes = 2 * (D * H + H * L + L * H + H * D)        # bf16 weights
    b_bytes = 4 * (2 * H + L + D)                         # f32 biases
    flops = 2 * B * (D * H + H * L + L * H + H * D)
    bytes_accessed = 4 * B * (2 * D + L) + w_bytes + b_bytes

    latent, recon = pl.pallas_call(
        _ae_kernel,
        out_shape=(
            jax.ShapeDtypeStruct((B, L), jnp.float32),   # latent (true width)
            jax.ShapeDtypeStruct((B, D), jnp.float32),   # reconstructed
        ),
        grid=grid,
        in_specs=[
            pl.BlockSpec((tb, D), lambda i: (i, 0)),     # x tile
            rep((D, H)), rep((1, H)),                    # enc fc1
            rep((H, L)), rep((1, L)),                    # enc fc2
            rep((L, H)), rep((1, H)),                    # dec fc1
            rep((H, D)), rep((1, D)),                    # dec fc2
        ],
        out_specs=[
            pl.BlockSpec((tb, L), lambda i: (i, 0)),     # latent tile
            pl.BlockSpec((tb, D), lambda i: (i, 0)),     # recon tile
        ],
        compiler_params=pltpu.CompilerParams(
            dimension_semantics=("parallel",),
            vmem_limit_bytes=vmem_limit),
        cost_estimate=pl.CostEstimate(
            flops=flops,
            transcendentals=B * D,       # sigmoid on the reconstruction
            bytes_accessed=bytes_accessed),
    )(x, w1, b1, w2, b2, w3, b3, w4, b4)

    return latent, recon


def autoencoder_forward(x, params):
    """(latent, reconstructed) = Autoencoder(latent_dim)(x), x of shape (B, D).
    `params` should come from prepare_params() (bf16 weights) for best perf."""
    B, D = x.shape
    H = params[0].shape[1]
    L = params[2].shape[1]
    tb = _pick_batch_tile(B, D, H, L, _vmem_budget_bytes())
    return _forward_impl(x, params, tb=tb)


# ---------------------------------------------------------------------------
# Init + reference + self-test.
# ---------------------------------------------------------------------------
def init_params(key, input_dim, hidden_dim, latent_dim):
    """Deterministic PyTorch-style (kaiming-uniform-ish) init, stored as (in, out)."""
    def linear(k, fan_in, fan_out):
        kw, kb = jax.random.split(k)
        bound = 1.0 / jnp.sqrt(fan_in)
        w = jax.random.uniform(kw, (fan_in, fan_out), jnp.float32, -bound, bound)
        b = jax.random.uniform(kb, (1, fan_out), jnp.float32, -bound, bound)
        return w, b

    k1, k2, k3, k4 = jax.random.split(key, 4)
    w1, b1 = linear(k1, input_dim, hidden_dim)    # encoder fc1
    w2, b2 = linear(k2, hidden_dim, latent_dim)   # encoder fc2
    w3, b3 = linear(k3, latent_dim, hidden_dim)   # decoder fc1
    w4, b4 = linear(k4, hidden_dim, input_dim)    # decoder fc2
    return (w1, b1, w2, b2, w3, b3, w4, b4)


def _reference(x, params):
    """Pure-JAX (f32) reference for sanity checking the kernel."""
    w1, b1, w2, b2, w3, b3, w4, b4 = params
    h1 = jnp.maximum(x @ w1 + b1, 0.0)
    z = h1 @ w2 + b2
    h2 = jnp.maximum(z @ w3 + b3, 0.0)
    y = jax.nn.sigmoid(h2 @ w4 + b4)
    return z, y


if __name__ == "__main__":
    key = jax.random.PRNGKey(0)
    k_x, k_p = jax.random.split(key)

    # Small shapes; batch deliberately not a multiple of 8 to exercise the
    # ragged-last-tile path (B=10 -> tile 16, 1 grid step, no pad/slice copies).
    batch, input_dim, hidden_dim, latent_dim = 10, 256, 128, 32

    x = jax.random.normal(k_x, (batch, input_dim), jnp.float32)
    params_f32 = init_params(k_p, input_dim, hidden_dim, latent_dim)

    # Weight preprocessing done ONCE, outside the per-call forward.
    params = prepare_params(params_f32)
    params = jax.block_until_ready(params)

    latent, recon = autoencoder_forward(x, params)
    jax.block_until_ready((latent, recon))

    ref_latent, ref_recon = _reference(x, params_f32)
    assert latent.shape == (batch, latent_dim)
    assert recon.shape == (batch, input_dim)
    # bf16 MXU operands with f32 accumulation -> ~1e-2 relative accuracy.
    assert jnp.allclose(latent, ref_latent, atol=2e-2, rtol=2e-2), \
        float(jnp.max(jnp.abs(latent - ref_latent)))
    assert jnp.allclose(recon, ref_recon, atol=2e-2, rtol=2e-2), \
        float(jnp.max(jnp.abs(recon - ref_recon)))

    print("KERNEL_OK")
</pallas_src>

<mosaic_0001>
module attributes {stable_mosaic.version = 11 : i64} {
  func.func @_ae_kernel(%arg0: i32, %arg1: memref<16x256xf32, #tpu.memory_space<vmem>>, %arg2: memref<256x128xbf16, #tpu.memory_space<vmem>>, %arg3: memref<1x128xf32, #tpu.memory_space<vmem>>, %arg4: memref<128x32xbf16, #tpu.memory_space<vmem>>, %arg5: memref<1x32xf32, #tpu.memory_space<vmem>>, %arg6: memref<32x128xbf16, #tpu.memory_space<vmem>>, %arg7: memref<1x128xf32, #tpu.memory_space<vmem>>, %arg8: memref<128x256xbf16, #tpu.memory_space<vmem>>, %arg9: memref<1x256xf32, #tpu.memory_space<vmem>>, %arg10: memref<16x32xf32, #tpu.memory_space<vmem>>, %arg11: memref<16x256xf32, #tpu.memory_space<vmem>>) attributes {dimension_semantics = [#tpu.dimension_semantics<parallel>], iteration_bounds = array<i64: 1>, scalar_prefetch = 0 : i64, scratch_operands = 0 : i64, tpu.core_type = #tpu.core_type<tc>, window_params = [{transform_indices = @transform_0, window_bounds = array<i64: 16, 256>}, {pipeline_mode = #tpu.pipeline_mode<synchronous>, transform_indices = @transform_1, window_bounds = array<i64: 256, 128>}, {pipeline_mode = #tpu.pipeline_mode<synchronous>, transform_indices = @transform_2, window_bounds = array<i64: 1, 128>}, {pipeline_mode = #tpu.pipeline_mode<synchronous>, transform_indices = @transform_3, window_bounds = array<i64: 128, 32>}, {pipeline_mode = #tpu.pipeline_mode<synchronous>, transform_indices = @transform_4, window_bounds = array<i64: 1, 32>}, {pipeline_mode = #tpu.pipeline_mode<synchronous>, transform_indices = @transform_5, window_bounds = array<i64: 32, 128>}, {pipeline_mode = #tpu.pipeline_mode<synchronous>, transform_indices = @transform_6, window_bounds = array<i64: 1, 128>}, {pipeline_mode = #tpu.pipeline_mode<synchronous>, transform_indices = @transform_7, window_bounds = array<i64: 128, 256>}, {pipeline_mode = #tpu.pipeline_mode<synchronous>, transform_indices = @transform_8, window_bounds = array<i64: 1, 256>}, {transform_indices = @transform_9, window_bounds = array<i64: 16, 32>}, {transform_indices = @transform_10, window_bounds = array<i64: 16, 256>}]} {
    %c0 = arith.constant 0 : index
    %c0_0 = arith.constant 0 : index
    %0 = vector.load %arg1[%c0, %c0_0] : memref<16x256xf32, #tpu.memory_space<vmem>>, vector<16x256xf32>
    %1 = arith.truncf %0 : vector<16x256xf32> to vector<16x256xbf16>
    %c0_1 = arith.constant 0 : index
    %c0_2 = arith.constant 0 : index
    %2 = vector.load %arg2[%c0_1, %c0_2] : memref<256x128xbf16, #tpu.memory_space<vmem>>, vector<256x128xbf16>
    %cst = arith.constant dense<0.000000e+00> : vector<16x128xf32>
    %3 = tpu.matmul %1, %2, %cst {dimension_numbers = #tpu.dot_dimension_numbers<[1], [0], [0], [1], [0, 0, 1, 1], [], []>} : vector<16x256xbf16>, vector<256x128xbf16>, vector<16x128xf32> -> vector<16x128xf32>
    %c0_3 = arith.constant 0 : index
    %c0_4 = arith.constant 0 : index
    %4 = vector.load %arg3[%c0_3, %c0_4] : memref<1x128xf32, #tpu.memory_space<vmem>>, vector<1x128xf32>
    %5 = vector.broadcast %4 : vector<1x128xf32> to vector<16x128xf32>
    %6 = arith.addf %3, %5 : vector<16x128xf32>
    %cst_5 = arith.constant 0.000000e+00 : f32
    %7 = vector.broadcast %cst_5 : f32 to vector<16x128xf32>
    %8 = arith.maximumf %6, %7 : vector<16x128xf32>
    %9 = arith.truncf %8 : vector<16x128xf32> to vector<16x128xbf16>
    %c0_6 = arith.constant 0 : index
    %c0_7 = arith.constant 0 : index
    %10 = vector.load %arg4[%c0_6, %c0_7] : memref<128x32xbf16, #tpu.memory_space<vmem>>, vector<128x32xbf16>
    %cst_8 = arith.constant dense<0.000000e+00> : vector<16x32xf32>
    %11 = tpu.matmul %9, %10, %cst_8 {dimension_numbers = #tpu.dot_dimension_numbers<[1], [0], [0], [1], [0, 0, 1, 1], [], []>} : vector<16x128xbf16>, vector<128x32xbf16>, vector<16x32xf32> -> vector<16x32xf32>
    %c0_9 = arith.constant 0 : index
    %c0_10 = arith.constant 0 : index
    %12 = vector.load %arg5[%c0_9, %c0_10] : memref<1x32xf32, #tpu.memory_space<vmem>>, vector<1x32xf32>
    %13 = vector.broadcast %12 : vector<1x32xf32> to vector<16x32xf32>
    %14 = arith.addf %11, %13 : vector<16x32xf32>
    %c0_11 = arith.constant 0 : index
    %c0_12 = arith.constant 0 : index
    %15 = vector.load %arg10[%c0_11, %c0_12] : memref<16x32xf32, #tpu.memory_space<vmem>>, vector<16x32xf32>
    tpu.vector_store %arg10[%c0_11, %c0_12], %14 {strides = array<i32>} : memref<16x32xf32, #tpu.memory_space<vmem>>, vector<16x32xf32>,
    %16 = arith.truncf %14 : vector<16x32xf32> to vector<16x32xbf16>
    %c0_13 = arith.constant 0 : index
    %c0_14 = arith.constant 0 : index
    %17 = vector.load %arg6[%c0_13, %c0_14] : memref<32x128xbf16, #tpu.memory_space<vmem>>, vector<32x128xbf16>
    %cst_15 = arith.constant dense<0.000000e+00> : vector<16x128xf32>
    %18 = tpu.matmul %16, %17, %cst_15 {dimension_numbers = #tpu.dot_dimension_numbers<[1], [0], [0], [1], [0, 0, 1, 1], [], []>} : vector<16x32xbf16>, vector<32x128xbf16>, vector<16x128xf32> -> vector<16x128xf32>
    %c0_16 = arith.constant 0 : index
    %c0_17 = arith.constant 0 : index
    %19 = vector.load %arg7[%c0_16, %c0_17] : memref<1x128xf32, #tpu.memory_space<vmem>>, vector<1x128xf32>
    %20 = vector.broadcast %19 : vector<1x128xf32> to vector<16x128xf32>
    %21 = arith.addf %18, %20 : vector<16x128xf32>
    %cst_18 = arith.constant 0.000000e+00 : f32
    %22 = vector.broadcast %cst_18 : f32 to vector<16x128xf32>
    %23 = arith.maximumf %21, %22 : vector<16x128xf32>
    %24 = arith.truncf %23 : vector<16x128xf32> to vector<16x128xbf16>
    %c0_19 = arith.constant 0 : index
    %c0_20 = arith.constant 0 : index
    %25 = vector.load %arg8[%c0_19, %c0_20] : memref<128x256xbf16, #tpu.memory_space<vmem>>, vector<128x256xbf16>
    %cst_21 = arith.constant dense<0.000000e+00> : vector<16x256xf32>
    %26 = tpu.matmul %24, %25, %cst_21 {dimension_numbers = #tpu.dot_dimension_numbers<[1], [0], [0], [1], [0, 0, 1, 1], [], []>} : vector<16x128xbf16>, vector<128x256xbf16>, vector<16x256xf32> -> vector<16x256xf32>
    %c0_22 = arith.constant 0 : index
    %c0_23 = arith.constant 0 : index
    %27 = vector.load %arg9[%c0_22, %c0_23] : memref<1x256xf32, #tpu.memory_space<vmem>>, vector<1x256xf32>
    %28 = vector.broadcast %27 : vector<1x256xf32> to vector<16x256xf32>
    %29 = arith.addf %26, %28 : vector<16x256xf32>
    %30 = arith.negf %29 : vector<16x256xf32>
    %31 = math.exp %30 : vector<16x256xf32>
    %cst_24 = arith.constant 1.000000e+00 : f32
    %32 = vector.broadcast %cst_24 : f32 to vector<16x256xf32>
    %33 = arith.addf %32, %31 : vector<16x256xf32>
    %34 = arith.divf %32, %33 : vector<16x256xf32>
    %c0_25 = arith.constant 0 : index
    %c0_26 = arith.constant 0 : index
    %35 = vector.load %arg11[%c0_25, %c0_26] : memref<16x256xf32, #tpu.memory_space<vmem>>, vector<16x256xf32>
    tpu.vector_store %arg11[%c0_25, %c0_26], %34 {strides = array<i32>} : memref<16x256xf32, #tpu.memory_space<vmem>>, vector<16x256xf32>,
    return
  }
  func.func @transform_0(%arg0: i32) -> (i32, i32) {
    %c0_i32 = arith.constant 0 : i32
    %c0_i32_0 = arith.constant 0 : i32
    return %arg0, %c0_i32 : i32, i32
  }
  func.func @transform_1(%arg0: i32) -> (i32, i32) {
    %c0_i32 = arith.constant 0 : i32
    %c0_i32_0 = arith.constant 0 : i32
    %c0_i32_1 = arith.constant 0 : i32
    return %c0_i32, %c0_i32_0 : i32, i32
  }
  func.func @transform_2(%arg0: i32) -> (i32, i32) {
    %c0_i32 = arith.constant 0 : i32
    %c0_i32_0 = arith.constant 0 : i32
    %c0_i32_1 = arith.constant 0 : i32
    return %c0_i32, %c0_i32_0 : i32, i32
  }
  func.func @transform_3(%arg0: i32) -> (i32, i32) {
    %c0_i32 = arith.constant 0 : i32
    %c0_i32_0 = arith.constant 0 : i32
    %c0_i32_1 = arith.constant 0 : i32
    return %c0_i32, %c0_i32_0 : i32, i32
  }
  func.func @transform_4(%arg0: i32) -> (i32, i32) {
    %c0_i32 = arith.constant 0 : i32
    %c0_i32_0 = arith.constant 0 : i32
    %c0_i32_1 = arith.constant 0 : i32
    return %c0_i32, %c0_i32_0 : i32, i32
  }
  func.func @transform_5(%arg0: i32) -> (i32, i32) {
    %c0_i32 = arith.constant 0 : i32
    %c0_i32_0 = arith.constant 0 : i32
    %c0_i32_1 = arith.constant 0 : i32
    return %c0_i32, %c0_i32_0 : i32, i32
  }
  func.func @transform_6(%arg0: i32) -> (i32, i32) {
    %c0_i32 = arith.constant 0 : i32
    %c0_i32_0 = arith.constant 0 : i32
    %c0_i32_1 = arith.constant 0 : i32
    return %c0_i32, %c0_i32_0 : i32, i32
  }
  func.func @transform_7(%arg0: i32) -> (i32, i32) {
    %c0_i32 = arith.constant 0 : i32
    %c0_i32_0 = arith.constant 0 : i32
    %c0_i32_1 = arith.constant 0 : i32
    return %c0_i32, %c0_i32_0 : i32, i32
  }
  func.func @transform_8(%arg0: i32) -> (i32, i32) {
    %c0_i32 = arith.constant 0 : i32
    %c0_i32_0 = arith.constant 0 : i32
    %c0_i32_1 = arith.constant 0 : i32
    return %c0_i32, %c0_i32_0 : i32, i32
  }
  func.func @transform_9(%arg0: i32) -> (i32, i32) {
    %c0_i32 = arith.constant 0 : i32
    %c0_i32_0 = arith.constant 0 : i32
    return %arg0, %c0_i32 : i32, i32
  }
  func.func @transform_10(%arg0: i32) -> (i32, i32) {
    %c0_i32 = arith.constant 0 : i32
    %c0_i32_0 = arith.constant 0 : i32
    return %arg0, %c0_i32 : i32, i32
  }
}

</mosaic_0001>

<bundles_post_ra>
// kernel: _forward_impl.1
= control target key start
LH: loop header
LB: loop body
LE: loop exit
PB: predicated region body
PF: predicated region fallthrough
CT: control target
= control target key end

     0   :  { %16 = vsyncpa [#allocation3], 0  ;;  %s1097_s0 = inlined_call_operand.vmem [shape: f32[10,256], index: 0, kind: input, shape index: {}]   ;;  %s1098_s1 = inlined_call_operand.hbm [shape: bf16[256,128], index: 1, kind: input, shape index: {}]   ;;  %s1099_s2 = inlined_call_operand.vmem [shape: f32[1,128], index: 2, kind: input, shape index: {}]   ;;  %s1100_s3 = inlined_call_operand.vmem [shape: bf16[128,32], index: 3, kind: input, shape index: {}]   ;;  %s1101_s4 = inlined_call_operand.vmem [shape: f32[1,32], index: 4, kind: input, shape index: {}]   ;;  %s1102_s5 = inlined_call_operand.vmem [shape: bf16[32,128], index: 5, kind: input, shape index: {}]   ;;  %s1103_s6 = inlined_call_operand.vmem [shape: f32[1,128], index: 6, kind: input, shape index: {}]   ;;  %s1104_s7 = inlined_call_operand.hbm [shape: bf16[128,256], index: 7, kind: input, shape index: {}]   ;;  %s1105_s8 = inlined_call_operand.vmem [shape: f32[1,256], index: 8, kind: input, shape index: {}]   ;;  %s1106_s9 = inlined_call_operand.hbm [shape: f32[10,32], index: 9, kind: output, shape index: {0}]   ;;  %s1107_s10 = inlined_call_operand.hbm [shape: f32[10,256], index: 10, kind: output, shape index: {1}]  }
   0x1   :  { %17 = vsyncpa [#allocation6], 0 }
   0x2   :  { %18 = vsyncpa [#allocation4], 0 }
   0x3   :  { %19 = vsyncpa [#allocation9], 0  ;;  %s26_s15 = sshll.u32 %s1098_s1, 4  ;;  %s960_s16 = smov [#allocation2]   ;;  %s27_s15 = int_to_ptr.hbm [resolvable:$true] %s26_s15 }
   0x4   :  { %s28_s17 = sshll.u32 %s960_s16, 4  ;;  %s49_s20 = sshll.u32 %s1104_s7, 4  ;;  %s29_s17 = int_to_ptr.vmem [resolvable:$true] %s28_s17  ;;  %s50_s20 = int_to_ptr.hbm [resolvable:$true] %s49_s20 }
   0x5   :  { %s961_s21 = smov 64   ;;  %s962_s22 = smov 4  }
   0x6   :  { %34 = dma.hbm_to_vmem [thread:$0]  %s27_s15, 2048, %s29_s17, [#allocation3], %s961_s21, %s961_s21, %s962_s22  }
   0x7   :  { %s963_s23 = smov [#allocation5]   ;;  %s964_s25 = smov 128  }
   0x8   :  { %s51_s24 = sshll.u32 %s963_s23, 4  ;;  %s965_s26 = smov 8   ;;  %s52_s24 = int_to_ptr.vmem [resolvable:$true] %s51_s24 }
   0x9   :  { %57 = dma.hbm_to_vmem [thread:$0]  %s50_s20, 2048, %s52_s24, [#allocation6], %s964_s25, %s964_s25, %s965_s26  }
   0xa   :  { %952 = dma.done.wait [#allocation3], 2048  }
   0xb   :  { %953 = vsyncadd [#allocation3], 4294965248 }
   0xc   :  { %954 = dma.done.wait [#allocation6], 2048  }
   0xd   :  { %955 = vsyncadd [#allocation6], 4294965248  ;;  %v792_v0 = vld [vmem:[#allocation2 + $0x38] sm:$0xff]  ;;  %v791_v2 = vld [vmem:[#allocation2 + $0x30] sm:$0xff]  ;;  %vm320_vm0 = vcmask 261120   ;;  %s580_s16 = sshll.u32 %s1106_s9, 4  ;;  %s581_s16 = int_to_ptr.hbm [resolvable:$true] %s580_s16 }
   0xe   :  { %v800_v1 = vld [vmem:[#allocation2 + $0x78] sm:$0xff]  ;;  %207 = vmatpush.bf16.msra.mxu0 %v792_v0  ;;  %v799_v3 = vld [vmem:[#allocation2 + $0x70] sm:$0xff]  ;;  %v790_v4 = vld [vmem:[#allocation2 + $0x28] sm:$0xff]  ;;  %s966_s17 = smov [#allocation7]   ;;  %s593_s20 = sshll.u32 %s1107_s10, 4  ;;  %s594_s20 = int_to_ptr.hbm [resolvable:$true] %s593_s20 }
   0xf   :  { %221 = vmatpush.bf16.msra.mxu1 %v800_v1  ;;  %v798_v5 = vld [vmem:[#allocation2 + $0x68] sm:$0xff]  ;;  %v808_v6 = vld [vmem:[%s1100_s3 + $0x38] sm:$0xff]  ;;  %v807_v7 = vld [vmem:[%s1100_s3 + $0x30] sm:$0xff]  ;;  %s578_s18 = sshll.u32 %s966_s17, 4  ;;  %s968_s21 = smov 256   ;;  %s579_s18 = int_to_ptr.vmem [resolvable:$true] %s578_s18 }
  0x10   :  { %306 = vmatpush.bf16.msra.mxu2 %v808_v6  ;;  %v789_v8 = vld [vmem:[#allocation2 + $0x20] sm:$0xff]  ;;  %v806_v10 = vld [vmem:[%s1100_s3 + $0x28] sm:$0xff]  ;;  %v788_v11 = vld [vmem:[#allocation2 + $0x18] sm:$0xff]  ;;  %s969_s22 = smov 16  }
  0x11   :  { %v797_v9 = vld [vmem:[#allocation2 + $0x60] sm:$0xff]  ;;  %v796_v12 = vld [vmem:[#allocation2 + $0x58] sm:$0xff]  ;;  %v787_v14 = vld [vmem:[#allocation2 + $0x10] sm:$0xff] }
  0x12   :  { %208 = vmatpush.bf16.msra.mxu0 %v791_v2  ;;  %v805_v13 = vld [vmem:[%s1100_s3 + $0x20] sm:$0xff]  ;;  %v795_v15 = vld [vmem:[#allocation2 + $0x50] sm:$0xff]  ;;  %v786_v16 = vld [vmem:[#allocation2 + $0x8] sm:$0xff] }
  0x13   :  { %222 = vmatpush.bf16.msra.mxu1 %v799_v3  ;;  %v794_v17 = vld [vmem:[#allocation2 + $0x48] sm:$0xff]  ;;  %v785_v18 = vld [vmem:[#allocation2] sm:$0xff]  ;;  %v71_v21 = vld [vmem:[%s1097_s0 + $0x10] sm:$0xff] }
  0x14   :  { %307 = vmatpush.bf16.msra.mxu2 %v807_v7  ;;  %v793_v19 = vld [vmem:[#allocation2 + $0x40] sm:$0xff]  ;;  %v70_v22 = vld [vmem:[%s1097_s0 + $0x8] sm:$0xff]  ;;  %v72_v23 = vld [vmem:[%s1097_s0 + $0x18] sm:$0xff] }
  0x15   :  { %v69_v20 = vld [vmem:[%s1097_s0] sm:$0xff]  ;;  %v74_v25 = vpack.c.bf16 %v72_v23, %v70_v22  ;;  %v804_v26 = vld [vmem:[%s1100_s3 + $0x18] sm:$0xff]  ;;  %v803_v27 = vld [vmem:[%s1100_s3 + $0x10] sm:$0xff] }
  0x16   :  { %209 = vmatpush.bf16.msra.mxu0 %v790_v4  ;;  %v73_v24 = vpack.c.bf16 %v71_v21, %v69_v20  ;;  %v802_v28 = vld [vmem:[%s1100_s3 + $0x8] sm:$0xff]  ;;  %v801_v29 = vld [vmem:[%s1100_s3] sm:$0xff]  ;;  %v775_v44 = vld [vmem:[#allocation5 + $0x70] sm:$0xf] }
  0x17   :  { %223 = vmatpush.bf16.msra.mxu1 %v798_v5  ;;  %v837_v32 = vld [vmem:[%s1099_s2] ss:$0 sm:$0xff]  ;;  %v810_v42 = vld [vmem:[%s1102_s5 + $0x8] sm:$0xff]  ;;  %v826_v45 = vld [vmem:[#allocation5 + $0x74] sm:$0xf0] }
  0x18   :  { %308 = vmatpush.bf16.msra.mxu2 %v806_v10  ;;  %353 = vmatpush.bf16.msra.mxu3 %v810_v42  ;;  %v809_v43 = vld [vmem:[%s1102_s5] sm:$0xff]  ;;  %v825_v46 = vld [vmem:[#allocation5 + $0x74] sm:$0xf]  ;;  %v776_v47 = vor.u32 %v826_v45, %v775_v44  ;;  %v777_v48 = vld [vmem:[#allocation5 + $0x78] sm:$0xf0] }
  0x19   :  { %v767_v49 = vld [vmem:[#allocation5 + $0x60] sm:$0xf]  ;;  %v824_v50 = vld [vmem:[#allocation5 + $0x64] sm:$0xf0]  ;;  %v780_v51 = vor.u32 %v825_v46, %v777_v48  ;;  %v823_v52 = vld [vmem:[#allocation5 + $0x64] sm:$0xf] }
  0x1a   :  { %210 = vmatpush.bf16.msra.mxu0 %v789_v8  ;;  %v769_v53 = vld [vmem:[#allocation5 + $0x68] sm:$0xf0]  ;;  %v768_v54 = vor.u32 %v824_v50, %v767_v49  ;;  %v759_v56 = vld [vmem:[#allocation5 + $0x50] sm:$0xf]  ;;  %v822_v57 = vld [vmem:[#allocation5 + $0x54] sm:$0xf0] }
  0x1b   :  { %224 = vmatpush.bf16.msra.mxu1 %v797_v9  ;;  %v772_v55 = vor.u32 %v823_v52, %v769_v53  ;;  %v821_v58 = vld [vmem:[#allocation5 + $0x54] sm:$0xf]  ;;  %v761_v59 = vld [vmem:[#allocation5 + $0x58] sm:$0xf0]  ;;  %v760_v60 = vor.u32 %v822_v57, %v759_v56  ;;  %v751_v62 = vld [vmem:[#allocation5 + $0x40] sm:$0xf] }
  0x1c   :  { %309 = vmatpush.bf16.msra.mxu2 %v805_v13  ;;  %354 = vmatpush.bf16.msra.mxu3 %v809_v43  ;;  %v764_v61 = vor.u32 %v821_v58, %v761_v59  ;;  %v820_v63 = vld [vmem:[#allocation5 + $0x44] sm:$0xf0]  ;;  %v819_v0 = vld [vmem:[#allocation5 + $0x44] sm:$0xf]  ;;  %v753_v1 = vld [vmem:[#allocation5 + $0x48] sm:$0xf0] }
  0x1d   :  { %v752_v2 = vor.u32 %v820_v63, %v751_v62  ;;  %v756_v3 = vor.u32 %v819_v0, %v753_v1  ;;  %v838_v4 = vld [vmem:[%s1101_s4] ss:$0 sm:$0xff]  ;;  %v743_v10 = vld [vmem:[#allocation5 + $0x30] sm:$0xf]  ;;  %v737_v20 = vld [vmem:[#allocation5 + $0x28] sm:$0xf0] }
  0x1e   :  { %211 = vmatpush.bf16.msra.mxu0 %v788_v11  ;;  %v818_v11 = vld [vmem:[#allocation5 + $0x34] sm:$0xf0]  ;;  %v727_v22 = vld [vmem:[#allocation5 + $0x10] sm:$0xf]  ;;  %v380_v42 = vld [vmem:[%s1105_s8] sm:$0x3] }
  0x1f   :  { %225 = vmatpush.bf16.msra.mxu1 %v796_v12  ;;  %v817_v12 = vld [vmem:[#allocation5 + $0x34] sm:$0xf]  ;;  %v744_v13 = vor.u32 %v818_v11, %v743_v10  ;;  %v814_v23 = vld [vmem:[#allocation5 + $0x14] sm:$0xf0]  ;;  %v383_v43 = vperm.slane %v380_v42, 1  ;;  %s967_s8 = smov [#allocation8]  }
  0x20   :  { %310 = vmatpush.bf16.msra.mxu2 %v804_v26  ;;  %466 = vmatpush.bf16.msrb.mxu3 %v776_v47  ;;  %v729_v26 = vld [vmem:[#allocation5 + $0x18] sm:$0xf0]  ;;  %v382_v47 = vperm.slane %v380_v42, 0  ;;  %s591_s9 = sshll.u32 %s967_s8, 4  ;;  %s592_s9 = int_to_ptr.vmem [resolvable:$true] %s591_s9 }
  0x22   :  { %212 = vmatpush.bf16.msra.mxu0 %v787_v14  ;;  %v745_v14 = vld [vmem:[#allocation5 + $0x38] sm:$0xf0] }
  0x23   :  { %226 = vmatpush.bf16.msra.mxu1 %v795_v15  ;;  %v748_v15 = vor.u32 %v817_v12, %v745_v14 }
  0x24   :  { %311 = vmatpush.bf16.msra.mxu2 %v803_v27  ;;  %467 = vmatpush.bf16.msrb.mxu3 %v768_v54 }
  0x26   :  { %213 = vmatpush.bf16.msra.mxu0 %v786_v16  ;;  %v735_v16 = vld [vmem:[#allocation5 + $0x20] sm:$0xf] }
  0x27   :  { %227 = vmatpush.bf16.msra.mxu1 %v794_v17  ;;  %v816_v17 = vld [vmem:[#allocation5 + $0x24] sm:$0xf0] }
  0x28   :  { %312 = vmatpush.bf16.msra.mxu2 %v802_v28  ;;  %468 = vmatpush.bf16.msrb.mxu3 %v760_v60  ;;  %v719_v28 = vld [vmem:[#allocation5] sm:$0xf] }
  0x2a   :  { %214 = vmatpush.bf16.msra.mxu0 %v785_v18  ;;  %v815_v18 = vld [vmem:[#allocation5 + $0x24] sm:$0xf] }
  0x2b   :  { %228 = vmatpush.bf16.msra.mxu1 %v793_v19  ;;  %v736_v19 = vor.u32 %v816_v17, %v735_v16  ;;  %v740_v21 = vor.u32 %v815_v18, %v737_v20 }
  0x2c   :  { %313 = vmatpush.bf16.msra.mxu2 %v801_v29  ;;  %469 = vmatpush.bf16.msrb.mxu3 %v752_v2  ;;  %v812_v29 = vld [vmem:[#allocation5 + $0x4] sm:$0xf0] }
  0x2d   :  { %215 = vmatmul.bf16.vlgmr.msra.gmra.mxu0 %v73_v24  ;;  %v813_v24 = vld [vmem:[#allocation5 + $0x14] sm:$0xf] }
  0x2e   :  { %229 = vmatmul.bf16.vlgmr.msra.gmra.mxu1 %v74_v25  ;;  %480 = vmatpush.bf16.msrb.mxu0 %v780_v51  ;;  %v728_v25 = vor.u32 %v814_v23, %v727_v22  ;;  %v732_v27 = vor.u32 %v813_v24, %v729_v26 }
  0x30   :  { %470 = vmatpush.bf16.msrb.mxu3 %v744_v13 }
  0x32   :  { %481 = vmatpush.bf16.msrb.mxu0 %v772_v55 }
  0x34   :  { %471 = vmatpush.bf16.msrb.mxu3 %v736_v19 }
  0x36   :  { %482 = vmatpush.bf16.msrb.mxu0 %v764_v61 }
  0x38   :  { %472 = vmatpush.bf16.msrb.mxu3 %v728_v25 }
  0x3a   :  { %483 = vmatpush.bf16.msrb.mxu0 %v756_v3 }
  0x3e   :  { %484 = vmatpush.bf16.msrb.mxu0 %v748_v15 }
  0x42   :  { %485 = vmatpush.bf16.msrb.mxu0 %v740_v21 }
  0x46   :  { %486 = vmatpush.bf16.msrb.mxu0 %v732_v27 }
  0xaa   :  { %v216_v30 = vpop.f32.mrf.mxu0 }
  0xab   :  { %v230_v31 = vpop.f32.mrf.mxu1  ;;  %v217_v33 = vadd.f32 %v837_v32, %v216_v30  ;;  %v811_v30 = vld [vmem:[#allocation5 + $0x4] sm:$0xf] }
  0xad   :  { %v231_v35 = vadd.f32 %v230_v31, %v217_v33  ;;  %v720_v31 = vor.u32 %v812_v29, %v719_v28 }
  0xaf   :  { %v235_v39 = vmax.f32 %v231_v35, 0.0  ;;  %473 = vmatpush.bf16.msrb.mxu3 %v720_v31  ;;  %v839_v35 = vld [vmem:[%s1103_s6] ss:$0 sm:$0xff] }
  0xb2   :  { %v218_v34 = vpop.f32.mrf.mxu0 }
  0xb3   :  { %v219_v36 = vadd.f32 %v837_v32, %v218_v34  ;;  %v232_v37 = vpop.f32.mrf.mxu1  ;;  %v721_v32 = vld [vmem:[#allocation5 + $0x8] sm:$0xf0] }
  0xb4   :  { %v724_v33 = vor.u32 %v811_v30, %v721_v32 }
  0xb5   :  { %v233_v38 = vadd.f32 %v232_v37, %v219_v36 }
  0xb6   :  { %487 = vmatpush.bf16.msrb.mxu0 %v724_v33 }
  0xb7   :  { %v236_v40 = vmax.f32 %v233_v38, 0.0 }
  0xb9   :  { %v237_v41 = vpack.c.bf16 %v236_v40, %v235_v39 }
  0xbb   :  { %314 = vmatmul.bf16.vlgmr.msra.gmra.mxu2 %v237_v41 }
 0x13e   :  { %v315_v5 = vpop.f32.mrf.mxu2 }
 0x13f   :  { %v316_v6 = vadd.f32 %v838_v4, %v315_v5 }
 0x141   :  { %321 = vst.msk [vmem:[#allocation7] sm:$0xff] %vm320_vm0, %v316_v6 }
 0x146   :  { %v317_v7 = vpop.f32.mrf.mxu2 }
 0x147   :  { %v318_v8 = vadd.f32 %v838_v4, %v317_v7 }
 0x149   :  { %v323_v9 = vpack.c.bf16 %v318_v8, %v316_v6  ;;  %322 = vst.msk [vmem:[#allocation7 + $0x8] sm:$0xff] %vm320_vm0, %v318_v8 }
 0x14a   :  { %586 = dma.vmem_to_hbm [thread:$0]  %s579_s18, 256, %s581_s16, [#allocation4], %s964_s25, %s964_s25, %s965_s26  }
 0x14b   :  { %716 = vmatmul.msk.bf16.vlgmr.msra.gmra.mxu3 %vm320_vm0, %v323_v9 }
 0x1ce   :  { %v356_v34 = vpop.f32.mrf.mxu3 }
 0x1cf   :  { %v357_v36 = vadd.f32 %v839_v35, %v356_v34 }
 0x1d1   :  { %v361_v39 = vmax.f32 %v357_v36, 0.0 }
 0x1d6   :  { %v358_v37 = vpop.f32.mrf.mxu3 }
 0x1d7   :  { %v359_v38 = vadd.f32 %v839_v35, %v358_v37 }
 0x1d9   :  { %v362_v40 = vmax.f32 %v359_v38, 0.0 }
 0x1db   :  { %v363_v41 = vpack.c.bf16 %v362_v40, %v361_v39 }
 0x1dd   :  { %474 = vmatmul.bf16.vlgmr.msrb.gmra.mxu3 %v363_v41  ;;  %488 = vmatmul.bf16.vlgmr.msrb.gmra.mxu0 %v363_v41 }
 0x25a   :  { %v489_v44 = vpop.f32.mrf.mxu0 }
 0x25b   :  { %v490_v45 = vadd.f32 %v489_v44, %v383_v43 }
 0x25d   :  { %v782_v46 = vmul.f32 -1.442695, %v490_v45 }
 0x25f   :  { %840 = vpow2.f32 %v782_v46 }
 0x260   :  { %v475_v48 = vpop.f32.mrf.mxu3 }
 0x261   :  { %v476_v49 = vadd.f32 %v475_v48, %v382_v47 }
 0x262   :  { %v491_v50 = vpop.f32.mrf.mxu0 }
 0x263   :  { %v781_v51 = vmul.f32 -1.442695, %v476_v49  ;;  %v492_v52 = vadd.f32 %v491_v50, %v383_v43 }
 0x265   :  { %v841_v53 = vpop.eup %840  ;;  %842 = vpow2.f32 %v781_v51  ;;  %v784_v54 = vmul.f32 -1.442695, %v492_v52 }
 0x266   :  { %v507_v55 = vadd.f32 1.0, %v841_v53 }
 0x267   :  { %844 = vpow2.f32 %v784_v54 }
 0x268   :  { %846 = vrcp.f32 %v507_v55  ;;  %v477_v56 = vpop.f32.mrf.mxu3  ;;  %v536_v2 = vand.u32 2147483648, %v507_v55  ;;  %v534_v5 = vand.u32 2147483647, %v507_v55  ;;  %vm530_vm2 = vweird.f32 %v507_v55 }
 0x269   :  { %v478_v57 = vadd.f32 %v477_v56, %v382_v47 }
 0x26a   :  { %v537_v10 = vor.u32 1.1754944e-38, %v536_v2  ;;  %vm535_vm4 = vcmp.eq.f32.partialorder %v534_v5, 8.507059e+37 }
 0x26b   :  { %v843_v58 = vpop.eup %842  ;;  %v783_v59 = vmul.f32 -1.442695, %v478_v57 }
 0x26c   :  { %v506_v60 = vadd.f32 1.0, %v843_v58 }
 0x26d   :  { %v845_v61 = vpop.eup %844  ;;  %848 = vpow2.f32 %v783_v59 }
 0x26e   :  { %v847_v62 = vpop.eup %846  ;;  %850 = vrcp.f32 %v506_v60  ;;  %v509_v0 = vadd.f32 1.0, %v845_v61  ;;  %v521_v15 = vand.u32 2147483648, %v506_v60  ;;  %v519_v18 = vand.u32 2147483647, %v506_v60 }
 0x26f   :  { %v526_v63 = vmul.f32 %v847_v62, %v507_v55  ;;  %vm531_vm1 = vweird.f32 %v847_v62  ;;  %vm515_vm6 = vweird.f32 %v506_v60 }
 0x270   :  { %852 = vrcp.f32 %v509_v0  ;;  %vm532_vm3 = vmor %vm530_vm2, %vm531_vm1  ;;  %v566_v21 = vand.u32 2147483648, %v509_v0  ;;  %v522_v23 = vor.u32 1.1754944e-38, %v521_v15  ;;  %v564_v25 = vand.u32 2147483647, %v509_v0 }
 0x271   :  { %v527_v1 = vsub.f32 1.0, %v526_v63  ;;  %vm520_vm9 = vcmp.eq.f32.partialorder %v519_v18, 8.507059e+37  ;;  %vm560_vm10 = vweird.f32 %v509_v0 }
 0x272   :  { %v567_v30 = vor.u32 1.1754944e-38, %v566_v21  ;;  %vm565_vm12 = vcmp.eq.f32.partialorder %v564_v25, 8.507059e+37 }
 0x273   :  { %v849_v3 = vpop.eup %848  ;;  %v528_v4 = vmul.f32 %v847_v62, %v527_v1 }
 0x274   :  { %v851_v6 = vpop.eup %850  ;;  %v508_v7 = vadd.f32 1.0, %v849_v3 }
 0x275   :  { %v529_v8 = vadd.f32 %v847_v62, %v528_v4  ;;  %v511_v9 = vmul.f32 %v851_v6, %v506_v60  ;;  %vm516_vm5 = vweird.f32 %v851_v6 }
 0x276   :  { %854 = vrcp.f32 %v508_v7  ;;  %v853_v11 = vpop.eup %852  ;;  %vm517_vm7 = vmor %vm515_vm6, %vm516_vm5  ;;  %v551_v33 = vand.u32 2147483648, %v508_v7  ;;  %v549_v36 = vand.u32 2147483647, %v508_v7  ;;  %vm545_vm14 = vweird.f32 %v508_v7 }
 0x277   :  { %v533_v12 = vsel %vm532_vm3, %v847_v62, %v529_v8  ;;  %v512_v13 = vsub.f32 1.0, %v511_v9  ;;  %v556_v16 = vmul.f32 %v853_v11, %v509_v0  ;;  %vm561_vm8 = vweird.f32 %v853_v11 }
 0x278   :  { %v538_v14 = vsel %vm535_vm4, %v537_v10, %v533_v12  ;;  %vm562_vm11 = vmor %vm560_vm10, %vm561_vm8  ;;  %v552_v38 = vor.u32 1.1754944e-38, %v551_v33  ;;  %vm550_vm0 = vcmp.eq.f32.partialorder %v549_v36, 8.507059e+37 }
 0x279   :  { %571 = vst [vmem:[#allocation8 + $0x8] sm:$0xff] %v538_v14  ;;  %v513_v17 = vmul.f32 %v851_v6, %v512_v13  ;;  %v557_v19 = vsub.f32 1.0, %v556_v16 }
 0x27b   :  { %v514_v20 = vadd.f32 %v851_v6, %v513_v17  ;;  %v558_v24 = vmul.f32 %v853_v11, %v557_v19 }
 0x27c   :  { %v855_v22 = vpop.eup %854 }
 0x27d   :  { %v518_v26 = vsel %vm517_vm7, %v851_v6, %v514_v20  ;;  %v541_v27 = vmul.f32 %v855_v22, %v508_v7  ;;  %v559_v29 = vadd.f32 %v853_v11, %v558_v24  ;;  %vm546_vm13 = vweird.f32 %v855_v22 }
 0x27e   :  { %v523_v28 = vsel %vm520_vm9, %v522_v23, %v518_v26  ;;  %vm547_vm15 = vmor %vm545_vm14, %vm546_vm13 }
 0x27f   :  { %570 = vst [vmem:[#allocation8] sm:$0xff] %v523_v28  ;;  %v542_v31 = vsub.f32 1.0, %v541_v27  ;;  %v563_v32 = vsel %vm562_vm11, %v853_v11, %v559_v29 }
 0x280   :  { %v568_v34 = vsel %vm565_vm12, %v567_v30, %v563_v32 }
 0x281   :  { %v543_v35 = vmul.f32 %v855_v22, %v542_v31  ;;  %573 = vst [vmem:[#allocation8 + $0x18] sm:$0xff] %v568_v34 }
 0x283   :  { %v544_v37 = vadd.f32 %v855_v22, %v543_v35 }
 0x285   :  { %v548_v39 = vsel %vm547_vm15, %v855_v22, %v544_v37 }
 0x286   :  { %v553_v40 = vsel %vm550_vm0, %v552_v38, %v548_v39 }
 0x287   :  { %572 = vst [vmem:[#allocation8 + $0x10] sm:$0xff] %v553_v40 }
 0x288   :  { %599 = dma.vmem_to_hbm [thread:$0]  %s592_s9, 512, %s594_s20, [#allocation9], %s968_s21, %s968_s21, %s969_s22  }
 0x289   :  { %956 = dma.done.wait [#allocation4], 256  }
 0x28a   :  { %957 = vsyncadd [#allocation4], 4294967040 }
 0x28b   :  { %958 = dma.done.wait [#allocation9], 512  }
 0x28c   :  { %959 = vsyncadd [#allocation9], 4294966784 }
 0x28d   :  { %608 = vsyncpa [#allocation3], 1 }
 0x28e   :  { %609 = vsyncpa [#allocation6], 1 }
 0x28f   :  { %610 = vsyncpa [#allocation4], 1 }
 0x290   :  { %611 = vsyncpa [#allocation9], 1 }

</bundles_post_ra>
